<compile_context>
chip_gen: v6e
topology: v6e:2x2x1
jax: 0.10.0
libtpu: 0.0.40
codegen_flags: <defaults>
</compile_context>

<pallas_src>
import functools
import numpy as np
import jax
import jax.numpy as jnp
from jax.experimental import pallas as pl
from jax.experimental.pallas import tpu as pltpu


def _composite_kernel(img_ref, out_ref, *, bg):
    # img_ref block: (1, 4, th, tw)   channels 0..2 = RGB, channel 3 = alpha
    # out_ref block: (1, 3, th, tw)
    alpha = img_ref[0, 3]                  # (th, tw)
    inv_alpha = 1.0 - alpha                # computed once, reused for all 3 channels
    for c in range(3):                     # static unroll; no (3, th, tw) broadcast temp
        out_ref[0, c] = (img_ref[0, c] * alpha + inv_alpha * bg[c]).astype(out_ref.dtype)


def _pick_tile(dim: int, pref: int, align: int) -> int:
    """Full extent if small (always legal, zero padding); else the align-multiple
    <= pref with the least cdiv padding (tie-break: larger tile)."""
    if dim <= pref:
        return dim
    best, best_waste = align, None
    t = align
    while t <= pref:
        waste = pl.cdiv(dim, t) * t - dim
        if best_waste is None or waste < best_waste or (waste == best_waste and t > best):
            best, best_waste = t, waste
        t += align
    return best


def _device_vmem_cap() -> int:
    try:
        return int(pltpu.get_tpu_info().vmem_capacity_bytes)
    except Exception:
        return 64 << 20  # conservative: v7x per-TensorCore VMEM


def composite_alpha(img: jax.Array, background) -> jax.Array:
    """JAX/Pallas equivalent of CompositeAlpha.forward. img: (..., C, H, W)."""
    if isinstance(background, (int, float)):
        background = (float(background),) * 3
    bg = tuple(float(b) for b in background)
    assert len(bg) == 3

    if img.shape[-3] == 3:                 # already RGB: pass through (module early return)
        return img

    # Float guard: integer inputs are promoted so the math matches float semantics.
    if not jnp.issubdtype(img.dtype, jnp.floating):
        img = img.astype(jnp.float32)

    orig_shape = img.shape
    C, H, W = orig_shape[-3], orig_shape[-2], orig_shape[-1]
    assert C >= 4, "alpha compositing needs at least 4 channels (RGBA)"
    batch_shape = orig_shape[:-3]

    # Tiny-input fast path: masked partial stores + per-step grid overhead dominate;
    # XLA's fused elementwise path is faster there.
    if W < 128 or H * W < 8 * 128:
        rgb = img[..., :3, :, :]
        alpha = img[..., 3:4, :, :]
        bg_arr = jnp.asarray(bg, img.dtype).reshape((1,) * len(batch_shape) + (3, 1, 1))
        return (rgb * alpha + (1.0 - alpha) * bg_arr).astype(img.dtype)

    B = int(np.prod(batch_shape)) if batch_shape else 1
    x = img.reshape(B, C, H, W)

    # Dtype-aware spatial tiling: lane-dense W tiles (128-multiples), sublane-aligned H tiles.
    itemsize = jnp.dtype(x.dtype).itemsize
    sub = max(8, 32 // itemsize)                       # 8 f32, 16 bf16, 32 int8
    plane_budget = 1 << 20                             # ~1 MiB per per-channel tile plane
    th_pref = 256
    tw_pref = max(128, min(4096, (plane_budget // (th_pref * itemsize)) // 128 * 128))
    th = _pick_tile(H, th_pref, sub)
    tw = _pick_tile(W, tw_pref, 128)
    gh = pl.cdiv(H, th)
    gw = pl.cdiv(W, tw)

    # Megacore guarantee: >= 2 grid steps so both v7x TensorCores get work.
    if B * gh * gw < 2:
        if W >= 2 * 128:
            tw = max(128, (W // 2) // 128 * 128)
            gw = pl.cdiv(W, tw)
        elif H >= 2 * sub:
            th = max(sub, (H // 2) // sub * sub)
            gh = pl.cdiv(H, th)

    # VMEM budget: double-buffered (4-ch in + 3-ch out) tiles + headroom for Mosaic's
    # internal f32 (th, tw) temporaries (alpha / inv_alpha / products). Capped at 3/4 of
    # the actual device VMEM so larger tiles can never exceed v7x's 64 MiB.
    tile_bytes = th * tw * itemsize
    scratch_bytes = 4 * th * tw * 4
    vmem_needed = 2 * (4 + 3) * tile_bytes + scratch_bytes + (2 << 20)
    vmem_bytes = max(4 << 20, min(vmem_needed, _device_vmem_cap() * 3 // 4))

    kernel = functools.partial(_composite_kernel, bg=bg)

    out = pl.pallas_call(
        kernel,
        out_shape=jax.ShapeDtypeStruct((B, 3, H, W), x.dtype),
        grid=(B, gh, gw),
        in_specs=[
            # channel block of 4 starting at 0 covers RGB + alpha even if C > 4
            pl.BlockSpec((1, 4, th, tw), lambda b, i, j: (b, 0, i, j)),
        ],
        out_specs=pl.BlockSpec((1, 3, th, tw), lambda b, i, j: (b, 0, i, j)),
        compiler_params=pltpu.CompilerParams(
            dimension_semantics=("parallel", "parallel", "parallel"),
            vmem_limit_bytes=int(vmem_bytes),
        ),
    )(x)

    return out.reshape(*batch_shape, 3, H, W)


if __name__ == "__main__":
    key = jax.random.PRNGKey(0)
    k1, k2 = jax.random.split(key)

    background = (0.25, 0.5, 0.75)
    bg_ref = jnp.asarray(background, jnp.float32).reshape(1, 3, 1, 1)

    # Deterministic RGBA batch that exercises the Pallas path: (B=2, C=4, H=16, W=256)
    rgb = jax.random.uniform(k1, (2, 3, 16, 256), dtype=jnp.float32)
    alpha = jax.random.uniform(k2, (2, 1, 16, 256), dtype=jnp.float32)
    img = jnp.concatenate([rgb, alpha], axis=1)

    out = jax.block_until_ready(composite_alpha(img, background))
    assert out.shape == (2, 3, 16, 256) and out.dtype == jnp.float32
    ref = rgb * alpha + (1.0 - alpha) * bg_ref
    np.testing.assert_allclose(np.asarray(out), np.asarray(ref), rtol=1e-6, atol=1e-6)

    # bf16 + B=1: exercises dtype-aware tiling and the megacore grid split (gw >= 2).
    img_b16 = img[:1].astype(jnp.bfloat16)
    out_b16 = jax.block_until_ready(composite_alpha(img_b16, background))
    assert out_b16.shape == (1, 3, 16, 256) and out_b16.dtype == jnp.bfloat16
    np.testing.assert_allclose(
        np.asarray(out_b16, dtype=np.float32), np.asarray(ref[:1]), rtol=2e-2, atol=2e-2
    )

    # Tiny-image fast path (W < 128): plain jnp, scalar background.
    small = img[..., :16]                              # (2, 4, 16, 16)
    out_s = jax.block_until_ready(composite_alpha(small, 0.5))
    ref_s = rgb[..., :16] * alpha[..., :16] + (1.0 - alpha[..., :16]) * 0.5
    np.testing.assert_allclose(np.asarray(out_s), np.asarray(ref_s), rtol=1e-6, atol=1e-6)

    # 3-channel input must pass through unchanged (module early-return path).
    out3 = jax.block_until_ready(composite_alpha(rgb, background))
    np.testing.assert_allclose(np.asarray(out3), np.asarray(rgb))

    print("KERNEL_OK")
</pallas_src>

<mosaic_0001>
module attributes {stable_mosaic.version = 11 : i64} {
  func.func @_composite_kernel(%arg0: i32, %arg1: i32, %arg2: i32, %arg3: memref<1x4x16x256xf32, #tpu.memory_space<vmem>>, %arg4: memref<1x3x16x256xf32, #tpu.memory_space<vmem>>) attributes {dimension_semantics = [#tpu.dimension_semantics<parallel>, #tpu.dimension_semantics<parallel>, #tpu.dimension_semantics<parallel>], iteration_bounds = array<i64: 2, 1, 1>, scalar_prefetch = 0 : i64, scratch_operands = 0 : i64, tpu.core_type = #tpu.core_type<tc>, window_params = [{transform_indices = @transform_0, window_bounds = array<i64: 1, 4, 16, 256>}, {transform_indices = @transform_1, window_bounds = array<i64: 1, 3, 16, 256>}]} {
    %c0 = arith.constant 0 : index
    %c3 = arith.constant 3 : index
    %c0_0 = arith.constant 0 : index
    %c0_1 = arith.constant 0 : index
    %0 = vector.load %arg3[%c0, %c3, %c0_0, %c0_1] : memref<1x4x16x256xf32, #tpu.memory_space<vmem>>, vector<1x1x16x256xf32>
    %1 = vector.shape_cast %0 : vector<1x1x16x256xf32> to vector<16x256xf32>
    %cst = arith.constant 1.000000e+00 : f32
    %2 = vector.broadcast %cst : f32 to vector<16x256xf32>
    %3 = arith.subf %2, %1 : vector<16x256xf32>
    %c0_2 = arith.constant 0 : index
    %c0_3 = arith.constant 0 : index
    %c0_4 = arith.constant 0 : index
    %c0_5 = arith.constant 0 : index
    %4 = vector.load %arg3[%c0_2, %c0_3, %c0_4, %c0_5] : memref<1x4x16x256xf32, #tpu.memory_space<vmem>>, vector<1x1x16x256xf32>
    %5 = vector.shape_cast %4 : vector<1x1x16x256xf32> to vector<16x256xf32>
    %6 = arith.mulf %5, %1 : vector<16x256xf32>
    %cst_6 = arith.constant 2.500000e-01 : f32
    %7 = vector.broadcast %cst_6 : f32 to vector<16x256xf32>
    %8 = arith.mulf %3, %7 : vector<16x256xf32>
    %9 = arith.addf %6, %8 : vector<16x256xf32>
    %c0_7 = arith.constant 0 : index
    %c0_8 = arith.constant 0 : index
    %c0_9 = arith.constant 0 : index
    %c0_10 = arith.constant 0 : index
    %10 = vector.load %arg4[%c0_7, %c0_8, %c0_9, %c0_10] : memref<1x3x16x256xf32, #tpu.memory_space<vmem>>, vector<1x1x16x256xf32>
    %11 = vector.shape_cast %10 : vector<1x1x16x256xf32> to vector<16x256xf32>
    %12 = vector.shape_cast %9 : vector<16x256xf32> to vector<1x1x16x256xf32>
    tpu.vector_store %arg4[%c0_7, %c0_8, %c0_9, %c0_10], %12 {strides = array<i32>} : memref<1x3x16x256xf32, #tpu.memory_space<vmem>>, vector<1x1x16x256xf32>,
    %c0_11 = arith.constant 0 : index
    %c1 = arith.constant 1 : index
    %c0_12 = arith.constant 0 : index
    %c0_13 = arith.constant 0 : index
    %13 = vector.load %arg3[%c0_11, %c1, %c0_12, %c0_13] : memref<1x4x16x256xf32, #tpu.memory_space<vmem>>, vector<1x1x16x256xf32>
    %14 = vector.shape_cast %13 : vector<1x1x16x256xf32> to vector<16x256xf32>
    %15 = arith.mulf %14, %1 : vector<16x256xf32>
    %cst_14 = arith.constant 5.000000e-01 : f32
    %16 = vector.broadcast %cst_14 : f32 to vector<16x256xf32>
    %17 = arith.mulf %3, %16 : vector<16x256xf32>
    %18 = arith.addf %15, %17 : vector<16x256xf32>
    %c0_15 = arith.constant 0 : index
    %c1_16 = arith.constant 1 : index
    %c0_17 = arith.constant 0 : index
    %c0_18 = arith.constant 0 : index
    %19 = vector.load %arg4[%c0_15, %c1_16, %c0_17, %c0_18] : memref<1x3x16x256xf32, #tpu.memory_space<vmem>>, vector<1x1x16x256xf32>
    %20 = vector.shape_cast %19 : vector<1x1x16x256xf32> to vector<16x256xf32>
    %21 = vector.shape_cast %18 : vector<16x256xf32> to vector<1x1x16x256xf32>
    tpu.vector_store %arg4[%c0_15, %c1_16, %c0_17, %c0_18], %21 {strides = array<i32>} : memref<1x3x16x256xf32, #tpu.memory_space<vmem>>, vector<1x1x16x256xf32>,
    %c0_19 = arith.constant 0 : index
    %c2 = arith.constant 2 : index
    %c0_20 = arith.constant 0 : index
    %c0_21 = arith.constant 0 : index
    %22 = vector.load %arg3[%c0_19, %c2, %c0_20, %c0_21] : memref<1x4x16x256xf32, #tpu.memory_space<vmem>>, vector<1x1x16x256xf32>
    %23 = vector.shape_cast %22 : vector<1x1x16x256xf32> to vector<16x256xf32>
    %24 = arith.mulf %23, %1 : vector<16x256xf32>
    %cst_22 = arith.constant 7.500000e-01 : f32
    %25 = vector.broadcast %cst_22 : f32 to vector<16x256xf32>
    %26 = arith.mulf %3, %25 : vector<16x256xf32>
    %27 = arith.addf %24, %26 : vector<16x256xf32>
    %c0_23 = arith.constant 0 : index
    %c2_24 = arith.constant 2 : index
    %c0_25 = arith.constant 0 : index
    %c0_26 = arith.constant 0 : index
    %28 = vector.load %arg4[%c0_23, %c2_24, %c0_25, %c0_26] : memref<1x3x16x256xf32, #tpu.memory_space<vmem>>, vector<1x1x16x256xf32>
    %29 = vector.shape_cast %28 : vector<1x1x16x256xf32> to vector<16x256xf32>
    %30 = vector.shape_cast %27 : vector<16x256xf32> to vector<1x1x16x256xf32>
    tpu.vector_store %arg4[%c0_23, %c2_24, %c0_25, %c0_26], %30 {strides = array<i32>} : memref<1x3x16x256xf32, #tpu.memory_space<vmem>>, vector<1x1x16x256xf32>,
    return
  }
  func.func @transform_0(%arg0: i32, %arg1: i32, %arg2: i32) -> (i32, i32, i32, i32) {
    %c0_i32 = arith.constant 0 : i32
    %c0_i32_0 = arith.constant 0 : i32
    return %arg0, %c0_i32, %arg1, %arg2 : i32, i32, i32, i32
  }
  func.func @transform_1(%arg0: i32, %arg1: i32, %arg2: i32) -> (i32, i32, i32, i32) {
    %c0_i32 = arith.constant 0 : i32
    %c0_i32_0 = arith.constant 0 : i32
    return %arg0, %c0_i32, %arg1, %arg2 : i32, i32, i32, i32
  }
}

</mosaic_0001>

<bundles_post_ra>
// kernel: tpu_custom_call.1
= control target key start
LH: loop header
LB: loop body
LE: loop exit
PB: predicated region body
PF: predicated region fallthrough
CT: control target
= control target key end

     0   :  { %6 = vsyncpa [#allocation3], 0  ;;  %s766_s0 = inlined_call_operand.hbm [shape: f32[2,4,16,256], index: 0, kind: input, shape index: {}]   ;;  %s767_s1 = inlined_call_operand.hbm [shape: f32[2,3,16,256], index: 1, kind: output, shape index: {}]  }
   0x1   :  { %8 = vsyncpa [#allocation3 + $0x1], 0 }
   0x2   :  { %9 = vsyncpa [#allocation4], 0 }
   0x3   :  { %11 = vsyncpa [#allocation4 + $0x1], 0  ;;  %s584_s6 = smov 0   ;;  %s586_s7 = smov 0  }
   0x4   :  { %s588_s8 = smov 0   ;;  %s590_s9 = smov 0  }
   0x5   :  { %s592_s10 = smov 0   ;;  %s594_s11 = smov 0  }
   0x6 LB: > { %s357_s12 = sadd.s32 4294967295, %s566_s11   ;;  %s358_s13 = sadd.s32 4294967294, %s566_s11   ;;  %s566_s11 = sphi %s594_s11, %s17_s11   ;;  %s562_s10 = sphi %s592_s10, %s778_s10   ;;  %s558_s9 = sphi %s590_s9, %s777_s9   ;;  %s554_s8 = sphi %s588_s8, %s776_s8   ;;  %s550_s7 = sphi %s586_s7, %s775_s7   ;;  %s546_s6 = sphi %s584_s6, %s774_s6  }
   0x7   : > { %s36_s14 = sadd.s32 1, %s562_s10  ;;  %s47_s15 = sadd.s32 1, %s554_s8 }
   0x8   : > { %p38_p0 = scmp.ge.s32.totalorder %s36_s14, 2  ;;  %p54_p1 = scmp.ne.s32.totalorder %s554_s8, %s550_s7 }
   0x9   : > { %p55_p2 = scmp.eq.s32.totalorder %s566_s11, 0  ;;  %p60_p3 = scmp.ne.s32.totalorder %s550_s7, %s546_s6 }
   0xa   : > { %s780_s14 = smov (%p38_p0, %s36_s14), 0  ;;  %p61_p5 = scmp.eq.s32.totalorder %s357_s12, 0 }
   0xb   : > { %p625_p4 = por %p55_p2, %p54_p1  ;;  %s40_s17 = ssub.s32 %s562_s10, %s780_s14 }
   0xc   : > { %p88_p6 = scmp.eq.s32.totalorder %s357_s12, 1  ;;  %p45_p7 = scmp.eq.s32.totalorder %s40_s17, 0 }
   0xd   : > { %p631_p8 = por %p61_p5, %p60_p3  ;;  %p94_p10 = scmp.eq.s32.totalorder %s358_s13, 1 }
   0xe   : > { %p635_p9 = por %p88_p6, %p54_p1  ;;  %p404_p13 = scmp.lt.s32.totalorder %s566_s11, 2 }
   0xf   : > { %s640_s20 = scalar_select %p45_p7, %s554_s8, %s47_s15  }
  0x10   : > { %p642_p11 = por %p94_p10, %p60_p3  ;;  %s114_s22 = sand.u32 1, %s554_s8  }
  0x11   : > { %s361_s23 = sshll.u32 %s114_s22, 7  ;;  %s389_s24 = sshll.u32 %s562_s10, 11 }
  0x12   : > { %s129_s27 = scalar_lea.hbm %s766_s0, %s389_s24  ;;  %s118_s28 = scalar_lea.vmem [#allocation2], %s361_s23 }
  0x13   : > { %s130_s29 = sshll.u32 %s118_s28, 4  ;;  %p655_p0 = pnand %p404_p13, %p625_p4  ;;  %s131_s29 = int_to_ptr.vmem [resolvable:$true] %s130_s29 }
  0x14   : > { %p364_p1 = scmp.ge.s32.totalorder %s566_s11, 1  ;;  %s115_s2 = scalar_lea.sflag [#allocation3], %s114_s22 }
  0x15   : > { %p460_p2 = pneg %p655_p0  ;;  %s471_s3 = scalar_lea.vmem %s131_s29, 2048 }
  0x16   : > { %p472_p3 = scmp.ne.s32.totalorder %s131_s29, %s471_s3  ;;  %s568_s4 = smov [#allocation2]  }
  0x17   : > { %s476_s5 = sshll.u32 %s568_s4, 4  ;;  %s477_s5 = int_to_ptr.vmem [resolvable:$false] %s476_s5 }
  0x18   : > { %p474_p5 = pnand %p472_p3, %p460_p2  ;;  %s478_s12 = scalar_lea.vmem %s477_s5, 4096 }
  0x19   : > { %p479_p7 = scmp.lt.s32.totalorder %s131_s29, %s477_s5  ;;  %p480_p10 = scmp.lt.s32.totalorder %s478_s12, %s471_s3 }
  0x1a   : > { %p475_p6 = pneg %p474_p5 }
  0x1b   : > { %p481_p12 = por %p480_p10, %p479_p7 }
  0x1d   : > { %p482_p4 = pnand %p481_p12, %p475_p6 }
  0x1f   : > { %485 = shalt.err (!%p482_p4)
}
  0x20   : > { %s569_s13 = smov 256   ;;  %s570_s15 = smov 16  }
  0x21   : > { %399 = dma.hbm_to_vmem [thread:$0]  (!%p655_p0), %s129_s27, 2048, %s131_s29, %s115_s2, %s569_s13, %s569_s13, %s570_s15  }
  0x22   : > { %p138_p13 = scmp.lt.s32.totalorder %s566_s11, 3 }
  0x24   : > { %p139_p2 = pnand %p364_p1, %p138_p13 }
  0x25   : > { %s668_s16 = sand.u32 (!%p139_p2), 1, %s550_s7  }
  0x26   : > { %142 = sbr.rel (%p139_p2) target bundleno = 72 (0x48), region = 24  ;;  %s365_s17 = sshll.u32 (!%p139_p2), %s668_s16, 7 }
  0x27   : > { %s145_s22 = scalar_lea.sflag (!%p139_p2), [#allocation3], %s668_s16  ;;  %s672_s23 = scalar_lea.vmem (!%p139_p2), [#allocation2], %s365_s17 }
  0x2b   : > { %537 = dma.done.wait (%p631_p8), %s145_s22, 2048  }
  0x2c   : > { %539 = vsyncadd (%p631_p8), %s145_s22, 4294965248  ;;  %s390_s24 = smul.u32 96, %s668_s16  ;;  %v366_v0 = vld [vmem:[%s672_s23 + $0x60] sm:$0xff]  ;;  %v367_v2 = vld [vmem:[%s672_s23 + $0x68] sm:$0xff]  ;;  %s245_s29 = scalar_lea.sflag [#allocation4], %s668_s16 }
  0x2d   : > { %v180_v1 = vld [vmem:[%s672_s23] sm:$0xff]  ;;  %v176_v3 = vsub.f32 1.0, %v366_v0  ;;  %v177_v5 = vsub.f32 1.0, %v367_v2  ;;  %v181_v6 = vld [vmem:[%s672_s23 + $0x8] sm:$0xff]  ;;  %v368_v7 = vld [vmem:[%s672_s23 + $0x70] sm:$0xff]  ;;  %s391_s25 = smul.u32 1536, %s558_s9 }
  0x2e   : > { %v184_v4 = vmul.f32 %v366_v0, %v180_v1  ;;  %v182_v8 = vld [vmem:[%s672_s23 + $0x10] sm:$0xff]  ;;  %v185_v9 = vmul.f32 %v367_v2, %v181_v6  ;;  %v178_v10 = vsub.f32 1.0, %v368_v7  ;;  %v369_v12 = vld [vmem:[%s672_s23 + $0x78] sm:$0xff]  ;;  %v370_v14 = vld [vmem:[%s672_s23 + $0x20] sm:$0xff]  ;;  %s696_s18 = scalar_lea.vmem [#allocation5], %s390_s24  ;;  %s571_s2 = smov [#allocation5]  }
  0x2f   : > { %v186_v11 = vmul.f32 %v368_v7, %v182_v8  ;;  %v183_v13 = vld [vmem:[%s672_s23 + $0x18] sm:$0xff]  ;;  %v188_v15 = vmul.f32 0.25, %v176_v3  ;;  %v189_v16 = vmul.f32 0.25, %v177_v5  ;;  %v179_v17 = vsub.f32 1.0, %v369_v12  ;;  %v371_v19 = vld [vmem:[%s672_s23 + $0x28] sm:$0xff]  ;;  %v372_v20 = vld [vmem:[%s672_s23 + $0x30] sm:$0xff]  ;;  %s713_s28 = scalar_lea.hbm %s767_s1, %s391_s25 }
  0x30   : > { %v187_v18 = vmul.f32 %v369_v12, %v183_v13  ;;  %v190_v21 = vmul.f32 0.25, %v178_v10  ;;  %v205_v22 = vmul.f32 %v370_v14, %v366_v0  ;;  %v209_v23 = vmul.f32 0.5, %v176_v3  ;;  %v373_v25 = vld [vmem:[%s672_s23 + $0x38] sm:$0xff]  ;;  %v378_v30 = vld [vmem:[%s672_s23 + $0x40] sm:$0xff]  ;;  %v379_v31 = vld [vmem:[%s672_s23 + $0x48] sm:$0xff]  ;;  %s263_s26 = sshll.u32 %s696_s18, 4  ;;  %s715_s26 = int_to_ptr.vmem [resolvable:$true] %s263_s26 }
  0x31   : > { %v206_v24 = vmul.f32 %v371_v19, %v367_v2  ;;  %v192_v26 = vadd.f32 %v188_v15, %v184_v4  ;;  %v193_v27 = vadd.f32 %v189_v16, %v185_v9  ;;  %v191_v28 = vmul.f32 0.25, %v179_v17  ;;  %v380_v36 = vld [vmem:[%s672_s23 + $0x50] sm:$0xff]  ;;  %v381_v41 = vld [vmem:[%s672_s23 + $0x58] sm:$0xff]  ;;  %s486_s30 = scalar_lea.vmem %s715_s26, 1536  ;;  %s490_s3 = sshll.u32 %s571_s2, 4  ;;  %s491_s3 = int_to_ptr.vmem [resolvable:$false] %s490_s3 }
  0x32   : > { %v210_v29 = vmul.f32 0.5, %v177_v5  ;;  %v194_v32 = vadd.f32 %v190_v21, %v186_v11  ;;  %v213_v33 = vadd.f32 %v209_v23, %v205_v22  ;;  %v207_v34 = vmul.f32 %v372_v20, %v368_v7  ;;  %p487_p8 = scmp.ne.s32.totalorder %s715_s26, %s486_s30  ;;  %s492_s4 = scalar_lea.vmem %s491_s3, 3072 }
  0x33   : > { %v211_v35 = vmul.f32 0.5, %v178_v10  ;;  %196 = vst [vmem:[%s696_s18] sm:$0xff] %v192_v26  ;;  %197 = vst [vmem:[%s696_s18 + $0x8] sm:$0xff] %v193_v27  ;;  %v195_v37 = vadd.f32 %v191_v28, %v187_v18  ;;  %v208_v39 = vmul.f32 %v373_v25, %v369_v12  ;;  %v212_v40 = vmul.f32 0.5, %v179_v17  ;;  %p493_p1 = scmp.lt.s32.totalorder %s715_s26, %s491_s3  ;;  %p494_p3 = scmp.lt.s32.totalorder %s492_s4, %s486_s30 }
  0x34   : > { %v214_v38 = vadd.f32 %v210_v29, %v206_v24  ;;  %198 = vst [vmem:[%s696_s18 + $0x10] sm:$0xff] %v194_v32  ;;  %374 = vst [vmem:[%s696_s18 + $0x20] sm:$0xff] %v213_v33  ;;  %v227_v43 = vmul.f32 %v378_v30, %v366_v0  ;;  %v231_v44 = vmul.f32 0.75, %v176_v3  ;;  %v228_v45 = vmul.f32 %v379_v31, %v367_v2  ;;  %p488_p12 = pnand %p487_p8, %p635_p9 }
  0x35   : > { %v215_v42 = vadd.f32 %v211_v35, %v207_v34  ;;  %199 = vst [vmem:[%s696_s18 + $0x18] sm:$0xff] %v195_v37  ;;  %v216_v46 = vadd.f32 %v212_v40, %v208_v39  ;;  %v232_v47 = vmul.f32 0.75, %v177_v5  ;;  %v229_v48 = vmul.f32 %v380_v36, %v368_v7  ;;  %p495_p5 = por %p494_p3, %p493_p1 }
  0x36   : > { %375 = vst [vmem:[%s696_s18 + $0x28] sm:$0xff] %v214_v38  ;;  %v233_v49 = vmul.f32 0.75, %v178_v10  ;;  %v235_v50 = vadd.f32 %v231_v44, %v227_v43  ;;  %v230_v51 = vmul.f32 %v381_v41, %v369_v12  ;;  %v234_v52 = vmul.f32 0.75, %v179_v17  ;;  %p489_p0 = pneg %p488_p12 }
  0x37   : > { %376 = vst [vmem:[%s696_s18 + $0x30] sm:$0xff] %v215_v42  ;;  %377 = vst [vmem:[%s696_s18 + $0x38] sm:$0xff] %v216_v46  ;;  %v236_v53 = vadd.f32 %v232_v47, %v228_v45 }
  0x38   : > { %v237_v54 = vadd.f32 %v233_v49, %v229_v48  ;;  %382 = vst [vmem:[%s696_s18 + $0x40] sm:$0xff] %v235_v50  ;;  %v238_v55 = vadd.f32 %v234_v52, %v230_v51  ;;  %p496_p6 = pnand %p495_p5, %p489_p0 }
  0x39   : > { %383 = vst [vmem:[%s696_s18 + $0x48] sm:$0xff] %v236_v53 }
  0x3a   : > { %384 = vst [vmem:[%s696_s18 + $0x50] sm:$0xff] %v237_v54  ;;  %385 = vst [vmem:[%s696_s18 + $0x58] sm:$0xff] %v238_v55 }
  0x3b   : > { %499 = shalt.err (!%p496_p6)
}
  0x3c   : > { %s500_s5 = scalar_lea.hbm %s713_s28, 1536  ;;  %s504_s15 = scalar_lea.hbm %s767_s1, 3072 }
  0x3d   : > { %p501_p7 = scmp.ne.s32.totalorder %s713_s28, %s500_s5  ;;  %p505_p13 = scmp.lt.s32.totalorder %s713_s28, %s767_s1 }
  0x3e   : > { %p506_p2 = scmp.lt.s32.totalorder %s504_s15, %s500_s5 }
  0x3f   : > { %p502_p10 = pnand %p501_p7, %p635_p9 }
  0x40   : > { %p507_p8 = por %p506_p2, %p505_p13 }
  0x41   : > { %p503_p4 = pneg %p502_p10 }
  0x43   : > { %p508_p12 = pnand %p507_p8, %p503_p4 }
  0x45   : > { %511 = shalt.err (!%p508_p12)
}
  0x46   : > { %s572_s23 = smov 256   ;;  %s573_s24 = smov 16  }
  0x47   : > { %394 = dma.vmem_to_hbm [thread:$0]  (%p635_p9), %s715_s26, 1536, %s713_s28, %s245_s29, %s572_s23, %s572_s23, %s573_s24  }
  0x48 PF: > { %s278_s18 = sand.u32 1, %s546_s6   ;;  %p773_p0 = scmp.ge.s32.totalorder %s566_s11, 2 }
  0x49   : > { %s279_s25 = scalar_lea.sflag [#allocation4], %s278_s18 }
  0x4a   : > { %p401_p1 = pnand %p773_p0, %p642_p11 }
  0x4c   : > { %p402_p3 = pneg %p401_p1 }
  0x4e   : > { %541 = dma.done.wait (%p402_p3), %s279_s25, 1536  }
  0x4f   : > { %543 = vsyncadd (%p402_p3), %s279_s25, 4294965760  ;;  %s17_s11 = sadd.s32 1, %s566_s11   ;;  %s774_s6 = smov %s550_s7 }
  0x50   : > { %p14_p5 = scmp.ge.s32.totalorder %s17_s11, 4   ;;  %s775_s7 = smov %s554_s8 }
  0x51   : > { %s776_s8 = smov %s640_s20  ;;  %s777_s9 = smov %s562_s10 }
  0x52   : > { %s778_s10 = smov %s780_s14  ;;  %16 = sbr.rel (!%p14_p5) target bundleno = 6 (0x6), region = 74 }
  0x57   :  { %284 = vsyncpa [#allocation3], 1 }
  0x58   :  { %286 = vsyncpa [#allocation3 + $0x1], 1 }
  0x59   :  { %287 = vsyncpa [#allocation4], 1 }
  0x5a   :  { %289 = vsyncpa [#allocation4 + $0x1], 1 }

</bundles_post_ra>
